<compile_context>
chip_gen: v5e
topology: v5e:2x2
jax: 0.10.0
libtpu: 0.0.40
codegen_flags: <defaults>
</compile_context>

<pallas_src>
import functools

import jax
import jax.numpy as jnp
from jax.experimental import pallas as pl
from jax.experimental.pallas import tpu as pltpu


def _conv_bn_kernel(x_ref, w_ref, shift_ref, o_ref, *, kh_sz, kw_sz, w_in, l_out):
    """Per-batch-element im2col conv + folded-BN shift.

    x_ref:     (1, C_in, H*W)            VMEM (lane-dense flat spatial)
    w_ref:     (C_out, KH*KW*C_in)       VMEM (BN scale already folded in)
    shift_ref: (C_out, 1)                VMEM (beta + (bias - mean) * scale)
    o_ref:     (1, C_out, L)             L = (H_out-1)*W + W_out ("wide" rows)
    """
    x = x_ref[0]  # (C_in, H*W)
    # Build the im2col patch matrix from 9 contiguous lane slices (no reshape,
    # no strided gather): tap (kh, kw) needs x[:, kh*W + kw : kh*W + kw + L].
    taps = []
    for kh in range(kh_sz):
        for kw in range(kw_sz):
            off = kh * w_in + kw
            taps.append(x[:, off:off + l_out])          # (C_in, L)
    patches = jnp.concatenate(taps, axis=0)             # (KH*KW*C_in, L)
    # Single MXU matmul, channels-major so the output is lane-dense.
    acc = jnp.dot(w_ref[...], patches,
                  preferred_element_type=jnp.float32)   # (C_out, L)
    o_ref[0] = (acc + shift_ref[...]).astype(o_ref.dtype)


def depthwise_conv2d_forward(x_nchw, weight_oihw, conv_bias,
                             bn_gamma, bn_beta, bn_mean, bn_var, eps=1e-5):
    """Conv2d(valid, stride=1, groups=1) + BatchNorm2d (eval mode).

    x_nchw:      (N, C_in, H, W)
    weight_oihw: (C_out, C_in, KH, KW)
    returns:     (N, C_out, H_out, W_out)
    """
    # TODO(synk): only the nn.Conv2d defaults (stride=1, padding=0, groups=1)
    # are implemented; other **kwargs of the PyTorch module are not supported.
    n, c_in, h, w = x_nchw.shape
    c_out, _, kh_sz, kw_sz = weight_oihw.shape
    h_out = h - kh_sz + 1
    w_out = w - kw_sz + 1
    # "Wide" flat output length: row i lives at [i*W, i*W + W_out); the last
    # tap's slice then ends exactly at H*W, so no input padding is needed.
    l_out = (h_out - 1) * w + w_out

    # Free reshape (no transpose, no HBM relayout).
    x_flat = x_nchw.reshape(n, c_in, h * w)

    # Fold conv bias + eval-mode BN into the weights (scale) and a shift.
    # TODO(synk): training-mode BatchNorm (batch statistics) is not implemented.
    scale = bn_gamma / jnp.sqrt(bn_var + eps)                 # (C_out,)
    shift = bn_beta + (conv_bias - bn_mean) * scale           # (C_out,)
    # OIHW -> (C_out, KH, KW, C_in) -> (C_out, KH*KW*C_in); tiny constant xform.
    w_mat = (jnp.transpose(weight_oihw, (0, 2, 3, 1))
             .reshape(c_out, kh_sz * kw_sz * c_in)
             * scale[:, None]).astype(jnp.float32)
    shift2 = shift.reshape(c_out, 1).astype(jnp.float32)

    kernel = functools.partial(
        _conv_bn_kernel, kh_sz=kh_sz, kw_sz=kw_sz, w_in=w, l_out=l_out)

    out_wide = pl.pallas_call(
        kernel,
        out_shape=jax.ShapeDtypeStruct((n, c_out, l_out), jnp.float32),
        grid_spec=pltpu.PrefetchScalarGridSpec(
            num_scalar_prefetch=0,
            grid=(n,),
            in_specs=[
                pl.BlockSpec((1, c_in, h * w), lambda b: (b, 0, 0)),
                pl.BlockSpec((c_out, kh_sz * kw_sz * c_in), lambda b: (0, 0)),
                pl.BlockSpec((c_out, 1), lambda b: (0, 0)),
            ],
            out_specs=pl.BlockSpec((1, c_out, l_out), lambda b: (b, 0, 0)),
        ),
        compiler_params=pltpu.CompilerParams(
            dimension_semantics=("parallel",)),
    )(x_flat, w_mat, shift2)

    # Un-widen on the tiny output: pad flat rows from L to H_out*W, reshape to
    # (N, C_out, H_out, W) and trim the (KW-1) junk columns per row.
    pad = h_out * w - l_out                                   # == kw_sz - 1
    out_full = jnp.pad(out_wide, ((0, 0), (0, 0), (0, pad)))
    return out_full.reshape(n, c_out, h_out, w)[:, :, :, :w_out]


def _reference(x_nchw, weight_oihw, conv_bias, bn_gamma, bn_beta, bn_mean,
               bn_var, eps=1e-5):
    y = jax.lax.conv_general_dilated(
        x_nchw, weight_oihw, window_strides=(1, 1), padding="VALID",
        dimension_numbers=("NCHW", "OIHW", "NCHW"))
    y = y + conv_bias[None, :, None, None]
    scale = bn_gamma / jnp.sqrt(bn_var + eps)
    return (y - bn_mean[None, :, None, None]) * scale[None, :, None, None] \
        + bn_beta[None, :, None, None]


if __name__ == "__main__":
    # Small shapes consistent with the module: Conv2d(4 -> 8, kernel=3) + BN(8).
    # NOTE: despite its name, the PyTorch module is a dense (groups=1) conv.
    N, C_IN, H, W = 2, 4, 16, 16
    C_OUT, K = 8, 3

    key = jax.random.PRNGKey(0)
    kx, kw, kb, kg, kbe, km, kv = jax.random.split(key, 7)

    x = jax.random.normal(kx, (N, C_IN, H, W), jnp.float32)
    weight = jax.random.normal(kw, (C_OUT, C_IN, K, K), jnp.float32) * 0.1
    conv_bias = jax.random.normal(kb, (C_OUT,), jnp.float32) * 0.1
    bn_gamma = 1.0 + 0.1 * jax.random.normal(kg, (C_OUT,), jnp.float32)
    bn_beta = 0.1 * jax.random.normal(kbe, (C_OUT,), jnp.float32)
    bn_mean = 0.1 * jax.random.normal(km, (C_OUT,), jnp.float32)
    bn_var = jnp.abs(jax.random.normal(kv, (C_OUT,), jnp.float32)) + 0.5

    out = depthwise_conv2d_forward(x, weight, conv_bias, bn_gamma, bn_beta,
                                   bn_mean, bn_var)
    out = jax.block_until_ready(out)

    ref = _reference(x, weight, conv_bias, bn_gamma, bn_beta, bn_mean, bn_var)
    assert out.shape == (N, C_OUT, H - K + 1, W - K + 1), out.shape
    assert jnp.allclose(out, ref, atol=1e-4, rtol=1e-4), \
        float(jnp.max(jnp.abs(out - ref)))

    print("KERNEL_OK")
</pallas_src>

<mosaic_0001>
module attributes {stable_mosaic.version = 11 : i64} {
  func.func @_conv_bn_kernel(%arg0: i32, %arg1: memref<1x4x256xf32, #tpu.memory_space<vmem>>, %arg2: memref<8x36xf32, #tpu.memory_space<vmem>>, %arg3: memref<8x1xf32, #tpu.memory_space<vmem>>, %arg4: memref<1x8x222xf32, #tpu.memory_space<vmem>>) attributes {dimension_semantics = [#tpu.dimension_semantics<parallel>], iteration_bounds = array<i64: 2>, scalar_prefetch = 0 : i64, scratch_operands = 0 : i64, tpu.core_type = #tpu.core_type<tc>, window_params = [{transform_indices = @transform_0, window_bounds = array<i64: 1, 4, 256>}, {pipeline_mode = #tpu.pipeline_mode<synchronous>, transform_indices = @transform_1, window_bounds = array<i64: 8, 36>}, {pipeline_mode = #tpu.pipeline_mode<synchronous>, transform_indices = @transform_2, window_bounds = array<i64: 8, 1>}, {transform_indices = @transform_3, window_bounds = array<i64: 1, 8, 222>}]} {
    %c0 = arith.constant 0 : index
    %c0_0 = arith.constant 0 : index
    %c0_1 = arith.constant 0 : index
    %0 = vector.load %arg1[%c0, %c0_0, %c0_1] : memref<1x4x256xf32, #tpu.memory_space<vmem>>, vector<1x4x256xf32>
    %1 = vector.shape_cast %0 : vector<1x4x256xf32> to vector<4x256xf32>
    %2 = vector.extract_strided_slice %1 {offsets = [0, 0], sizes = [4, 222], strides = [1, 1]} : vector<4x256xf32> to vector<4x222xf32>
    %3 = vector.extract_strided_slice %1 {offsets = [0, 1], sizes = [4, 222], strides = [1, 1]} : vector<4x256xf32> to vector<4x222xf32>
    %4 = vector.extract_strided_slice %1 {offsets = [0, 2], sizes = [4, 222], strides = [1, 1]} : vector<4x256xf32> to vector<4x222xf32>
    %5 = vector.extract_strided_slice %1 {offsets = [0, 16], sizes = [4, 222], strides = [1, 1]} : vector<4x256xf32> to vector<4x222xf32>
    %6 = vector.extract_strided_slice %1 {offsets = [0, 17], sizes = [4, 222], strides = [1, 1]} : vector<4x256xf32> to vector<4x222xf32>
    %7 = vector.extract_strided_slice %1 {offsets = [0, 18], sizes = [4, 222], strides = [1, 1]} : vector<4x256xf32> to vector<4x222xf32>
    %8 = vector.extract_strided_slice %1 {offsets = [0, 32], sizes = [4, 222], strides = [1, 1]} : vector<4x256xf32> to vector<4x222xf32>
    %9 = vector.extract_strided_slice %1 {offsets = [0, 33], sizes = [4, 222], strides = [1, 1]} : vector<4x256xf32> to vector<4x222xf32>
    %10 = vector.extract_strided_slice %1 {offsets = [0, 34], sizes = [4, 222], strides = [1, 1]} : vector<4x256xf32> to vector<4x222xf32>
    %11 = tpu.concatenate %2, %3, %4, %5, %6, %7, %8, %9, %10 in 0 : vector<4x222xf32>, vector<4x222xf32>, vector<4x222xf32>, vector<4x222xf32>, vector<4x222xf32>, vector<4x222xf32>, vector<4x222xf32>, vector<4x222xf32>, vector<4x222xf32> -> vector<36x222xf32>
    %c0_2 = arith.constant 0 : index
    %c0_3 = arith.constant 0 : index
    %12 = vector.load %arg2[%c0_2, %c0_3] : memref<8x36xf32, #tpu.memory_space<vmem>>, vector<8x36xf32>
    %cst = arith.constant dense<0.000000e+00> : vector<8x222xf32>
    %13 = tpu.matmul %12, %11, %cst {dimension_numbers = #tpu.dot_dimension_numbers<[1], [0], [0], [1], [0, 0, 1, 1], [], []>} : vector<8x36xf32>, vector<36x222xf32>, vector<8x222xf32> -> vector<8x222xf32>
    %c0_4 = arith.constant 0 : index
    %c0_5 = arith.constant 0 : index
    %14 = vector.load %arg3[%c0_4, %c0_5] : memref<8x1xf32, #tpu.memory_space<vmem>>, vector<8x1xf32>
    %15 = vector.broadcast %14 : vector<8x1xf32> to vector<8x222xf32>
    %16 = arith.addf %13, %15 : vector<8x222xf32>
    %c0_6 = arith.constant 0 : index
    %c0_7 = arith.constant 0 : index
    %c0_8 = arith.constant 0 : index
    %17 = vector.load %arg4[%c0_6, %c0_7, %c0_8] : memref<1x8x222xf32, #tpu.memory_space<vmem>>, vector<1x8x222xf32>
    %18 = vector.shape_cast %17 : vector<1x8x222xf32> to vector<8x222xf32>
    %19 = vector.shape_cast %16 : vector<8x222xf32> to vector<1x8x222xf32>
    tpu.vector_store %arg4[%c0_6, %c0_7, %c0_8], %19 {strides = array<i32>} : memref<1x8x222xf32, #tpu.memory_space<vmem>>, vector<1x8x222xf32>,
    return
  }
  func.func @transform_0(%arg0: i32) -> (i32, i32, i32) {
    %c0_i32 = arith.constant 0 : i32
    %c0_i32_0 = arith.constant 0 : i32
    %c0_i32_1 = arith.constant 0 : i32
    return %arg0, %c0_i32, %c0_i32_0 : i32, i32, i32
  }
  func.func @transform_1(%arg0: i32) -> (i32, i32) {
    %c0_i32 = arith.constant 0 : i32
    %c0_i32_0 = arith.constant 0 : i32
    %c0_i32_1 = arith.constant 0 : i32
    return %c0_i32, %c0_i32_0 : i32, i32
  }
  func.func @transform_2(%arg0: i32) -> (i32, i32) {
    %c0_i32 = arith.constant 0 : i32
    %c0_i32_0 = arith.constant 0 : i32
    %c0_i32_1 = arith.constant 0 : i32
    return %c0_i32, %c0_i32_0 : i32, i32
  }
  func.func @transform_3(%arg0: i32) -> (i32, i32, i32) {
    %c0_i32 = arith.constant 0 : i32
    %c0_i32_0 = arith.constant 0 : i32
    %c0_i32_1 = arith.constant 0 : i32
    return %arg0, %c0_i32, %c0_i32_0 : i32, i32, i32
  }
}

</mosaic_0001>

<bundles_post_ra>
// kernel: tpu_custom_call.1
= control target key start
LH: loop header
LB: loop body
LE: loop exit
PB: predicated region body
PF: predicated region fallthrough
CT: control target
= control target key end

     0   :  { %8 = vsyncpa [#allocation3], 0  ;;  %s829_s0 = inlined_call_operand.hbm [shape: f32[2,4,256], index: 0, kind: input, shape index: {}]   ;;  %s830_s1 = inlined_call_operand.vmem [shape: f32[8,36], index: 1, kind: input, shape index: {}]   ;;  %s831_s2 = inlined_call_operand.vmem [shape: f32[8,1], index: 2, kind: input, shape index: {}]   ;;  %s832_s3 = inlined_call_operand.hbm [shape: f32[2,8,222], index: 3, kind: output, shape index: {}]  }
   0x1   :  { %10 = vsyncpa [#allocation3 + $0x1], 0 }
   0x2   :  { %11 = vsyncpa [#allocation4], 0 }
   0x3   :  { %13 = vsyncpa [#allocation4 + $0x1], 0  ;;  %s677_s12 = smov 0   ;;  %s679_s13 = smov 0  }
   0x4   :  { %s681_s14 = smov 0   ;;  %s683_s15 = smov 0  }
   0x5 LB: > { %s698_s16 = sadd.s32 4294967295, %s646_s15   ;;  %s439_s17 = sadd.s32 4294967294, %s646_s15   ;;  %s646_s15 = sphi %s683_s15, %s842_s15   ;;  %s642_s14 = sphi %s681_s14, %s841_s14   ;;  %s638_s13 = sphi %s679_s13, %s840_s13   ;;  %s634_s12 = sphi %s677_s12, %s839_s12  }
   0x6   : > { %s702_s18 = sadd.s32 1, %s646_s15   ;;  %s26_s19 = sadd.s32 1, %s642_s14 }
   0x7   : > { %s23_s20 = ssub.s32 %s646_s15, %s702_s18  ;;  %p33_p0 = scmp.ne.s32.totalorder %s642_s14, %s638_s13 }
   0x8   : > { %p24_p1 = scmp.eq.s32.totalorder %s23_s20, 0  ;;  %p34_p2 = scmp.eq.s32.totalorder %s646_s15, 0 }
   0x9   : > { %p39_p3 = scmp.ne.s32.totalorder %s638_s13, %s634_s12  ;;  %p40_p4 = scmp.eq.s32.totalorder %s698_s16, 0 }
   0xa   : > { %s714_s21 = scalar_select %p24_p1, %s642_s14, %s26_s19  }
   0xb   : > { %p716_p5 = por %p34_p2, %p33_p0  ;;  %p720_p6 = por %p40_p4, %p39_p3 }
   0xc   : > { %p105_p7 = scmp.eq.s32.totalorder %s698_s16, 1  ;;  %p111_p8 = scmp.eq.s32.totalorder %s439_s17, 1 }
   0xd   : > { %p471_p10 = scmp.lt.s32.totalorder %s646_s15, 2  ;;  %s137_s26 = sand.u32 1, %s642_s14  }
   0xe   : > { %p727_p11 = por %p105_p7, %p33_p0  ;;  %p731_p12 = por %p111_p8, %p39_p3 }
   0xf   : > { %s457_s27 = sshll.u32 %s646_s15, 3  ;;  %s442_s28 = sshll.u32 %s137_s26, 3 }
  0x10   : > { %s146_s4 = scalar_lea.hbm %s829_s0, %s457_s27  ;;  %s141_s6 = scalar_lea.vmem [#allocation2], %s442_s28 }
  0x11   : > { %s148_s5 = sshll.u32 %s146_s4, 4  ;;  %s150_s7 = sshll.u32 %s141_s6, 4  ;;  %s149_s5 = int_to_ptr.hbm [resolvable:$true] %s148_s5  ;;  %s151_s7 = int_to_ptr.vmem [resolvable:$true] %s150_s7 }
  0x12   : > { %p742_p13 = pnand %p471_p10, %p716_p5  ;;  %p445_p0 = scmp.ge.s32.totalorder %s646_s15, 1 }
  0x13   : > { %p155_p1 = scmp.lt.s32.totalorder %s646_s15, 3  ;;  %s138_s9 = scalar_lea.sflag [#allocation3], %s137_s26 }
  0x14   : > { %s550_s10 = sshra.s32 %s149_s5, 4  ;;  %p554_p3 = pneg %p742_p13  ;;  %s551_s10 = int_to_ptr.hbm [resolvable:$true] %s550_s10 }
  0x15   : > { %s552_s11 = scalar_lea.hbm %s551_s10, 8  ;;  %s557_s20 = scalar_lea.hbm %s829_s0, 16 }
  0x16   : > { %p553_p2 = scmp.ne.s32.totalorder %s551_s10, %s552_s11  ;;  %p558_p5 = scmp.lt.s32.totalorder %s551_s10, %s829_s0 }
  0x17   : > { %p559_p8 = scmp.lt.s32.totalorder %s557_s20, %s552_s11 }
  0x18   : > { %p555_p4 = pnand %p554_p3, %p553_p2 }
  0x19   : > { %p560_p10 = por %p559_p8, %p558_p5 }
  0x1a   : > { %p556_p7 = pneg %p555_p4 }
  0x1c   : > { %p561_p9 = pnand %p560_p10, %p556_p7 }
  0x1e   : > { %564 = shalt.err (!%p561_p9)
}
  0x1f   : > { %466 = dma.hbm_to_vmem [thread:$0]  (!%p742_p13), %s149_s5, 128, %s151_s7, %s138_s9  }
  0x20   : > { %p156_p2 = pnand %p445_p0, %p155_p1 }
  0x21   : > { %s763_s26 = sand.u32 (!%p156_p2), 1, %s638_s13  }
  0x22   : > { %159 = sbr.rel (%p156_p2) target bundleno = 382 (0x17e), region = 32  ;;  %s446_s28 = sshll.u32 (!%p156_p2), %s763_s26, 3 }
  0x23   : > { %s162_s29 = scalar_lea.sflag (!%p156_p2), [#allocation3], %s763_s26  ;;  %s165_s30 = scalar_lea.vmem (!%p156_p2), [#allocation2], %s446_s28 }
  0x27   : > { %625 = dma.done.wait (%p720_p6), %s162_s29, 128  }
  0x28   : > { %627 = vsyncadd (%p720_p6), %s162_s29, 4294967168  ;;  %v189_v0 = vld [vmem:[%s165_s30] sm:$0xff]  ;;  %s648_s23 = smov 96   ;;  %s649_s4 = smov 111   ;;  %v296_v28 = vld [vmem:[%s831_s2] sm:$0xff]  ;;  %v656_v29 = vmov 0  }
  0x29   : > { %191 = vst [vmem:[#allocation1] ss:$2 sm:$0xff] %v189_v0  ;;  %s650_s5 = smov 95   ;;  %s651_s6 = smov 110   ;;  %549 = vset.pattern.permute.xlu0 %v656_v29  ;;  %vm261_vm0 = vcmask 785408   ;;  %vm273_vm1 = vcmask 777216  }
  0x2a   : > { %s652_s7 = smov 94   ;;  %s653_s8 = smov 112   ;;  %vm284_vm2 = vcmask 769024   ;;  %vm238_vm3 = vcmask 908288   ;;  %vm250_vm4 = vcmask 900096   ;;  %vm286_vm5 = vcmask 1043456  }
  0x2b   : > { %s654_s9 = smov 127   ;;  %s655_s10 = smov 126   ;;  %vm227_vm6 = vcmask 916480   ;;  %vm204_vm7 = vcmask 1039360   ;;  %vm215_vm8 = vcmask 1031168   ;;  %vm302_vm9 = vcmask 293888  }
  0x2c   : > { %s447_s22 = sshll.u32 %s763_s26, 4  ;;  %s458_s27 = sshll.u32 %s698_s16, 4 }
  0x2d   : > { %s364_s30 = scalar_lea.hbm %s832_s3, %s458_s27 }
  0x30   : > { %v771_v1 = vld.sshfl [vmem:[#allocation1] sm:$0xff pattern:$0x75316420]  ;;  %v773_v2 = vld.sshfl [vmem:[#allocation1 + $0x8] sm:$0xff pattern:$0x75316420] }
  0x31   : > { %197 = vst [vmem:[#allocation1 + $0x1] ss:$2 sm:$0xff] %v189_v0 }
  0x38   : > { %v198_v3 = vld.sshfl [vmem:[#allocation1] sm:$0xff pattern:$0x75316420]  ;;  %v199_v4 = vld.sshfl [vmem:[#allocation1 + $0x8] sm:$0xff pattern:$0x75316420] }
  0x39   : > { %208 = vst [vmem:[#allocation1] ss:$2 sm:$0xff] %v189_v0  ;;  %v544_v22 = vpack.i.bf16 %v199_v4, %v198_v3 }
  0x40   : > { %v209_v5 = vld.sshfl [vmem:[#allocation1] sm:$0xff pattern:$0x75316420]  ;;  %v210_v6 = vld.sshfl [vmem:[#allocation1 + $0x8] sm:$0xff pattern:$0x75316420] }
  0x41   : > { %220 = vst [vmem:[#allocation1 + $0x1] ss:$2 sm:$0xff] %v189_v0  ;;  %v534_v25 = vpack.i.bf16 %v210_v6, %v209_v5  ;;  %v295_v5 = vld [vmem:[%s830_s1] sm:$0xff] }
  0x48   : > { %v221_v7 = vld.sshfl [vmem:[#allocation1] sm:$0xff pattern:$0x75316420]  ;;  %v222_v8 = vld.sshfl [vmem:[#allocation1 + $0x8] sm:$0xff pattern:$0x75316420] }
  0x49   : > { %231 = vst [vmem:[#allocation1] ss:$2 sm:$0xff] %v189_v0  ;;  %v539_v21 = vpack.i.bf16 %v222_v8, %v221_v7 }
  0x50   : > { %v232_v9 = vld.sshfl [vmem:[#allocation1] sm:$0xff pattern:$0x75316420]  ;;  %v233_v10 = vld.sshfl [vmem:[#allocation1 + $0x8] sm:$0xff pattern:$0x75316420] }
  0x51   : > { %243 = vst [vmem:[#allocation1 + $0x1] ss:$2 sm:$0xff] %v189_v0  ;;  %v514_v16 = vpack.i.bf16 %v233_v10, %v232_v9 }
  0x53   : > { %515 = vrot.lane.b32.xlu2 %v514_v16, %s649_s4 }
  0x58   : > { %v244_v11 = vld.sshfl [vmem:[#allocation1] sm:$0xff pattern:$0x75316420]  ;;  %v245_v12 = vld.sshfl [vmem:[#allocation1 + $0x8] sm:$0xff pattern:$0x75316420] }
  0x59   : > { %254 = vst [vmem:[#allocation1] ss:$2 sm:$0xff] %v189_v0  ;;  %v519_v17 = vpack.i.bf16 %v245_v12, %v244_v11 }
  0x5b   : > { %520 = vrot.lane.b32.xlu2 %v519_v17, %s651_s6  ;;  %s353_s6 = scalar_lea.sflag [#allocation4], %s763_s26 }
  0x60   : > { %v255_v13 = vld.sshfl [vmem:[#allocation1] sm:$0xff pattern:$0x75316420]  ;;  %v256_v14 = vld.sshfl [vmem:[#allocation1 + $0x8] sm:$0xff pattern:$0x75316420] }
  0x61   : > { %v524_v15 = vpack.i.bf16 %v256_v14, %v255_v13  ;;  %266 = vst [vmem:[#allocation1 + $0x1] ss:$2 sm:$0xff] %v189_v0 }
  0x63   : > { %525 = vrot.lane.b32.xlu1 %v524_v15, %s648_s23  ;;  %545 = vrot.lane.b32.xlu2 %v544_v22, %s654_s9  ;;  %s188_s23 = scalar_lea.vmem [#allocation5], %s447_s22 }
  0x64   : > { %s366_s4 = sshll.u32 %s188_s23, 4  ;;  %s367_s4 = int_to_ptr.vmem [resolvable:$true] %s366_s4 }
  0x68   : > { %v267_v18 = vld.sshfl [vmem:[#allocation1] sm:$0xff pattern:$0x75316420]  ;;  %v268_v19 = vld.sshfl [vmem:[#allocation1 + $0x8] sm:$0xff pattern:$0x75316420] }
  0x69   : > { %v529_v20 = vpack.i.bf16 %v268_v19, %v267_v18  ;;  %277 = vst [vmem:[#allocation1] ss:$2 sm:$0xff] %v189_v0 }
  0x6b   : > { %530 = vrot.lane.b32.xlu1 %v529_v20, %s650_s5  ;;  %s368_s5 = sshll.u32 %s364_s30, 4  ;;  %s369_s5 = int_to_ptr.hbm [resolvable:$true] %s368_s5 }
  0x6c   : > { %s594_s16 = sshra.s32 %s369_s5, 4  ;;  %s595_s16 = int_to_ptr.hbm [resolvable:$true] %s594_s16 }
  0x6d   : > { %p601_p0 = scmp.lt.s32.totalorder %s595_s16, %s832_s3 }
  0x70   : > { %v278_v23 = vld.sshfl [vmem:[#allocation1] sm:$0xff pattern:$0x75316420]  ;;  %v279_v24 = vld.sshfl [vmem:[#allocation1 + $0x8] sm:$0xff pattern:$0x75316420] }
  0x71   : > { %280 = vrot.lane.b32.xlu0 %v278_v23, %s652_s7 }
  0x73   : > { %540 = vrot.lane.b32.xlu1 %v539_v21, %s653_s8 }
  0x79   : > { %282 = vrot.lane.b32.xlu0 %v279_v24, %s652_s7  ;;  %s596_s7 = scalar_lea.hbm %s595_s16, 16 }
  0x7a   : > { %p597_p6 = scmp.ne.s32.totalorder %s595_s16, %s596_s7 }
  0x7c   : > { %p598_p9 = pnand %p597_p6, %p727_p11 }
  0x7e   : > { %p599_p13 = pneg %p598_p9 }
  0x81   : > { %535 = vrot.lane.b32.xlu0 %v534_v25, %s655_s10  ;;  %s600_s10 = scalar_lea.hbm %s832_s3, 32 }
  0x82   : > { %p602_p1 = scmp.lt.s32.totalorder %s600_s10, %s596_s7 }
  0x84   : > { %p603_p3 = por %p602_p1, %p601_p0 }
  0x86   : > { %p604_p4 = pnand %p603_p3, %p599_p13 }
  0x89   : > { %299 = vperm.xlu0 %549, %v296_v28  }
  0xad   : > { %v516_v27 = vpop.permute.xlu2 %515 }
  0xae   : > { %v518_v33 = vunpack.i.h.bf16 %v516_v27  ;;  %v517_v34 = vunpack.i.l.bf16 %v516_v27 }
  0xb0   : > { %v239_v45 = vsel %vm238_vm3, %v517_v34, %v518_v33 }
  0xb5   : > { %v521_v32 = vpop.permute.xlu2 %520 }
  0xb6   : > { %v523_v39 = vunpack.i.h.bf16 %v521_v32  ;;  %v522_v40 = vunpack.i.l.bf16 %v521_v32 }
  0xb8   : > { %v251_v46 = vsel %vm250_vm4, %v522_v40, %v523_v39  ;;  %v292_v51 = vsel %vm286_vm5, %v518_v33, %v523_v39 }
  0xb9   : > { %v291_v52 = vsel %vm286_vm5, %v239_v45, %v251_v46 }
  0xbd   : > { %v546_v49 = vpop.permute.xlu2 %545 }
  0xbe   : > { %v548_v55 = vunpack.i.h.bf16 %v546_v49  ;;  %v547_v56 = vunpack.i.l.bf16 %v546_v49 }
  0xc0   : > { %v205_v61 = vsel %vm204_vm7, %v547_v56, %v548_v55  ;;  %v288_v0 = vsel %vm286_vm5, %v773_v2, %v548_v55 }
  0xc1   : > { %v287_v4 = vsel %vm286_vm5, %v771_v1, %v205_v61 }
  0xd5   : > { %v526_v26 = vpop.permute.xlu1 %525 }
  0xd6   : > { %v528_v35 = vunpack.i.h.bf16 %v526_v26  ;;  %v527_v36 = vunpack.i.l.bf16 %v526_v26 }
  0xd8   : > { %v262_v42 = vsel %vm261_vm0, %v527_v36, %v528_v35 }
  0xdd   : > { %v531_v31 = vpop.permute.xlu1 %530 }
  0xde   : > { %v533_v37 = vunpack.i.h.bf16 %v531_v31  ;;  %v532_v38 = vunpack.i.l.bf16 %v531_v31 }
  0xe0   : > { %v274_v43 = vsel %vm273_vm1, %v532_v38, %v533_v37  ;;  %v294_v47 = vsel %vm286_vm5, %v528_v35, %v533_v37 }
  0xe1   : > { %v293_v50 = vsel %vm286_vm5, %v262_v42, %v274_v43 }
  0xe3   : > { %v281_v30 = vpop.permute.xlu0 %280 }
  0xe5   : > { %v541_v48 = vpop.permute.xlu1 %540 }
  0xe6   : > { %v543_v53 = vunpack.i.h.bf16 %v541_v48  ;;  %v542_v54 = vunpack.i.l.bf16 %v541_v48 }
  0xe8   : > { %v228_v60 = vsel %vm227_vm6, %v542_v54, %v543_v53 }
  0xeb   : > { %v283_v41 = vpop.permute.xlu0 %282 }
  0xec   : > { %450 = vmatpush.msk.msra.mxu1 %vm286_vm5, %v283_v41  ;;  %v285_v44 = vsel %vm284_vm2, %v281_v30, %v283_v41 }
  0xed   : > { %448 = vmatpush.msk.msra.mxu0 %vm286_vm5, %v285_v44 }
  0xee   : > { %342 = vmatpush.msra.mxu1 %v294_v47 }
  0xef   : > { %322 = vmatpush.msra.mxu0 %v293_v50 }
  0xf0   : > { %343 = vmatpush.msra.mxu1 %v292_v51 }
  0xf1   : > { %323 = vmatpush.msra.mxu0 %v291_v52 }
  0xf3   : > { %v536_v57 = vpop.permute.xlu0 %535 }
  0xf4   : > { %v538_v58 = vunpack.i.h.bf16 %v536_v57  ;;  %v537_v59 = vunpack.i.l.bf16 %v536_v57 }
  0xf6   : > { %v290_v62 = vsel %vm286_vm5, %v538_v58, %v543_v53  ;;  %v216_v63 = vsel %vm215_vm8, %v537_v59, %v538_v58 }
  0xf7   : > { %344 = vmatpush.msra.mxu1 %v290_v62  ;;  %v289_v3 = vsel %vm286_vm5, %v216_v63, %v228_v60 }
  0xf8   : > { %324 = vmatpush.msra.mxu0 %v289_v3 }
  0xf9   : > { %345 = vmatpush.msra.mxu1 %v288_v0 }
  0xfa   : > { %325 = vmatpush.msra.mxu0 %v287_v4  ;;  %451 = vmatmul.msk.f32.vlgmr.msra.gmra.mxu1 %vm302_vm9, %v295_v5 }
  0xfb   : > { %449 = vmatmul.msk.f32.vlgmr.msra.gmra.mxu0 %vm302_vm9, %v295_v5  ;;  %v300_v2 = vpop.permute.xlu0 %299 }
 0x177   : > { %v347_v1 = vpop.f32.mrf.mxu1 }
 0x178   : > { %v327_v6 = vpop.f32.mrf.mxu0  ;;  %v348_v7 = vadd.f32 %v347_v1, %v300_v2 }
 0x179   : > { %v328_v8 = vadd.f32 %v327_v6, %v300_v2 }
 0x17a   : > { %351 = vst.msk [vmem:[%s188_s23 + $0x8] sm:$0xff] %vm284_vm2, %v348_v7 }
 0x17b   : > { %350 = vst [vmem:[%s188_s23] sm:$0xff] %v328_v8 }
 0x17c   : > { %607 = shalt.err (!%p604_p4)
}
 0x17d   : > { %461 = dma.vmem_to_hbm [thread:$0]  (%p727_p11), %s367_s4, 256, %s369_s5, %s353_s6  }
 0x17e PF: > { %s380_s26 = sand.u32 1, %s634_s12   ;;  %p838_p7 = scmp.ge.s32.totalorder %s646_s15, 2 }
 0x17f   : > { %s381_s19 = scalar_lea.sflag [#allocation4], %s380_s26 }
 0x180   : > { %p468_p5 = pnand %p838_p7, %p731_p12 }
 0x182   : > { %p469_p8 = pneg %p468_p5 }
 0x184   : > { %629 = dma.done.wait (%p469_p8), %s381_s19, 256  }
 0x185   : > { %631 = vsyncadd (%p469_p8), %s381_s19, 4294967040  ;;  %p16_p10 = scmp.ge.s32.totalorder %s702_s18, 4   ;;  %s839_s12 = smov %s638_s13 }
 0x186   : > { %s840_s13 = smov %s642_s14  ;;  %s841_s14 = smov %s714_s21 }
 0x187   : > { %s842_s15 = smov %s702_s18  ;;  %18 = sbr.rel (!%p16_p10) target bundleno = 5 (0x5), region = 81 }
 0x18c   :  { %387 = vsyncpa [#allocation3], 1 }
 0x18d   :  { %389 = vsyncpa [#allocation3 + $0x1], 1 }
 0x18e   :  { %390 = vsyncpa [#allocation4], 1 }
 0x18f   :  { %392 = vsyncpa [#allocation4 + $0x1], 1 }

</bundles_post_ra>
